<compile_context>
chip_gen: v6e
topology: v6e:2x2x1
jax: 0.10.0
libtpu: 0.0.40
codegen_flags: <defaults>
</compile_context>

<pallas_src>
import functools

import jax
import jax.numpy as jnp
from jax.experimental import pallas as pl
from jax.experimental.pallas import tpu as pltpu


# ---------------------------------------------------------------------------
# Fused Gram + epilogue kernel
# ---------------------------------------------------------------------------
def _sp_fused_kernel(s_ref, t_ref, loss_ref, gs_acc, gt_acc, *,
                     n_k_s, last_s, n_k_t, last_t, inv_bs2):
    """Stream D tiles of s and t, accumulate both Gram matrices in VMEM
    scratch, and on the last step emit the normalized scalar SP loss to SMEM.

    Grid = (n_k,): the flattened-feature (lane) axis reduction.
    Static per-input params: n_k_x = number of valid tiles, last_x = number of
    valid lanes in the final tile (== tile width when D divides evenly).
    """
    k = pl.program_id(0)
    n_k = pl.num_programs(0)

    @pl.when(k == 0)
    def _():
        gs_acc[...] = jnp.zeros_like(gs_acc)
        gt_acc[...] = jnp.zeros_like(gt_acc)

    # Contract the feature (lane) axis of both operands: x @ x.T.
    contract_lanes = (((1,), (1,)), ((), ()))

    def _accumulate(x_ref, acc_ref, n_k_x, last_x):
        tk_x = x_ref.shape[1]

        def _do():
            x = x_ref[...]
            if last_x != tk_x:
                # Ragged tail: lanes past D in the last tile are not backed by
                # real data (Pallas leaves them undefined) -> zero them so they
                # cannot corrupt the Gram matrix.
                lanes = jax.lax.broadcasted_iota(jnp.int32, x.shape, 1)
                lim = jnp.where(k == n_k_x - 1, last_x, tk_x)
                x = jnp.where(lanes < lim, x, jnp.zeros_like(x))
            acc_ref[...] += jax.lax.dot_general(
                x, x, contract_lanes, preferred_element_type=jnp.float32)

        if n_k_x == n_k:
            _do()                       # fast path: every grid step is valid
        else:
            pl.when(k < n_k_x)(_do)     # shorter input: skip its trailing steps

    _accumulate(s_ref, gs_acc, n_k_s, last_s)
    _accumulate(t_ref, gt_acc, n_k_t, last_t)

    @pl.when(k == n_k - 1)
    def _():
        eps = jnp.float32(1e-12)
        gs = gs_acc[...]
        gt = gt_acc[...]
        # F.normalize(x, p=2, dim=1): x / max(||x||_2, eps) per row.
        gs = gs / jnp.maximum(
            jnp.sqrt(jnp.sum(gs * gs, axis=1, keepdims=True)), eps)
        gt = gt / jnp.maximum(
            jnp.sqrt(jnp.sum(gt * gt, axis=1, keepdims=True)), eps)
        diff = gt - gs
        loss_ref[0, 0] = jnp.sum(diff * diff) * jnp.float32(inv_bs2)


# ---------------------------------------------------------------------------
# Tiling plan
# ---------------------------------------------------------------------------
def _round_up(x, m):
    return ((x + m - 1) // m) * m


def _cdiv(a, b):
    return (a + b - 1) // b


# Plan against a per-TensorCore VMEM figure: v7x has 64 MiB/TC, so never plan
# above that even if get_tpu_info reports a larger (per-chip) capacity.
_VMEM_PLAN_CAP = 64 * 1024 * 1024
_TARGET_STEP_BYTES = 4 * 1024 * 1024   # ~per-step DMA payload across both inputs
_MIN_PIPELINE_STEPS = 4                # keep >=4 reduction steps for DMA/MXU overlap


def _vmem_capacity_bytes():
    try:
        cap = int(pltpu.get_tpu_info().vmem_capacity_bytes)
    except Exception:
        cap = _VMEM_PLAN_CAP
    return min(cap, _VMEM_PLAN_CAP)


def _padded_rows(bs, itemsize):
    # Sublane packing: 8 rows for 4-byte, 16 for 2-byte, 32 for 1-byte dtypes.
    return _round_up(bs, max(32 // max(int(itemsize), 1), 8))


def _plan(bs, d_s, isize_s, d_t, isize_t):
    """Choose the grid length n_k and per-input (tile, n_tiles, last_valid)."""
    cap = _vmem_capacity_bytes()
    # f32 Gram accumulators (sublane/lane padded) held in VMEM scratch.
    scratch_bytes = 2 * _round_up(bs, 8) * _round_up(bs, 128) * 4
    vmem_limit = min((3 * cap) // 4, 48 * 1024 * 1024)
    in_budget = max(((vmem_limit - scratch_bytes) * 2) // 3, 2 * 1024 * 1024)

    col_s = _padded_rows(bs, isize_s) * isize_s   # bytes per feature column
    col_t = _padded_rows(bs, isize_t) * isize_t
    d_s128 = _round_up(d_s, 128)
    d_t128 = _round_up(d_t, 128)
    one_pass = col_s * d_s128 + col_t * d_t128    # VMEM bytes for the full sweep

    max_nk = _cdiv(max(d_s128, d_t128), 128)      # tk floor is 128 lanes
    n_k = max(_cdiv(one_pass, _TARGET_STEP_BYTES),      # ~4 MiB per step
              _cdiv(2 * one_pass, in_budget),           # double-buffer fits VMEM
              min(_MIN_PIPELINE_STEPS, max_nk))         # enough steps to pipeline
    n_k = min(n_k, max_nk)

    def per_input(d):
        tk = _round_up(_cdiv(d, n_k), 128)
        n_k_i = _cdiv(d, tk)
        last = d - (n_k_i - 1) * tk
        return tk, n_k_i, last

    return n_k, per_input(d_s), per_input(d_t), vmem_limit


# ---------------------------------------------------------------------------
# Wrappers
# ---------------------------------------------------------------------------
def similarity_loss_pallas(s_f, t_f):
    """One (student, teacher) feature pair -> scalar SP loss (float32)."""
    bs = s_f.shape[0]
    assert t_f.shape[0] == bs
    s2 = jnp.reshape(s_f, (bs, -1))    # native dtype end-to-end, no padding copy
    t2 = jnp.reshape(t_f, (bs, -1))
    d_s, d_t = s2.shape[1], t2.shape[1]

    n_k, (tk_s, n_k_s, last_s), (tk_t, n_k_t, last_t), vmem_limit = _plan(
        bs, d_s, s2.dtype.itemsize, d_t, t2.dtype.itemsize)

    def _in_spec(tk, n_k_i):
        if n_k_i == n_k:
            return pl.BlockSpec((bs, tk), lambda k: (0, k))
        # Shorter input: clamp the block index so the (skipped) trailing grid
        # steps keep pointing at the same valid block (consecutive equal block
        # indices -> no re-DMA) instead of reading out of bounds.
        return pl.BlockSpec(
            (bs, tk), lambda k, last=n_k_i - 1: (0, jnp.minimum(k, last)))

    kernel = functools.partial(
        _sp_fused_kernel,
        n_k_s=n_k_s, last_s=last_s, n_k_t=n_k_t, last_t=last_t,
        inv_bs2=1.0 / float(bs * bs))

    loss = pl.pallas_call(
        kernel,
        out_shape=jax.ShapeDtypeStruct((1, 1), jnp.float32),
        grid_spec=pltpu.PrefetchScalarGridSpec(
            num_scalar_prefetch=0,
            grid=(n_k,),
            in_specs=[_in_spec(tk_s, n_k_s), _in_spec(tk_t, n_k_t)],
            out_specs=pl.BlockSpec(memory_space=pltpu.SMEM),
            scratch_shapes=[pltpu.VMEM((bs, bs), jnp.float32),
                            pltpu.VMEM((bs, bs), jnp.float32)]),
        compiler_params=pltpu.CompilerParams(
            dimension_semantics=("arbitrary",),
            vmem_limit_bytes=vmem_limit),
    )(s2, t2)
    return loss[0, 0]


def similarity_forward(s_g, t_g):
    """Equivalent of Similarity.forward: sum of per-pair SP losses.

    Returns a shape-(1,) float32 array, matching the PyTorch module's output.
    One fused kernel launch per pair (Gram sweep + epilogue); merging pairs
    into a single call would require stacking/padding them to a common D,
    i.e. an extra HBM pass over every feature map, so it is not done.
    """
    total = jnp.float32(0.0)
    for s_f, t_f in zip(s_g, t_g):
        total = total + similarity_loss_pallas(s_f, t_f)
    return jnp.reshape(total, (1,))


# ---------------------------------------------------------------------------
# Pure-JAX reference for sanity checking
# ---------------------------------------------------------------------------
def _reference(s_g, t_g):
    total = 0.0
    for s_f, t_f in zip(s_g, t_g):
        bs = s_f.shape[0]
        s = jnp.reshape(s_f, (bs, -1)).astype(jnp.float32)
        t = jnp.reshape(t_f, (bs, -1)).astype(jnp.float32)
        gs = s @ s.T
        gt = t @ t.T
        gs = gs / jnp.maximum(
            jnp.linalg.norm(gs, axis=1, keepdims=True), 1e-12)
        gt = gt / jnp.maximum(
            jnp.linalg.norm(gt, axis=1, keepdims=True), 1e-12)
        total = total + jnp.sum((gt - gs) ** 2) / (bs * bs)
    return jnp.reshape(total, (1,))


if __name__ == "__main__":
    key = jax.random.PRNGKey(0)
    k1, k2, k3, k4, k5, k6 = jax.random.split(key, 6)

    # Three (student, teacher) feature-map pairs, NCHW.
    #  * pair 0: equal shapes, D multiple of 128 (all fast paths)
    #  * pair 1: different student/teacher channel counts (D_s != D_t)
    #  * pair 2: ragged D (105 / 210) exercising the in-kernel tail masking
    #    and the clamped-index "shorter input" path.
    s_g = [
        jax.random.normal(k1, (2, 4, 16, 16), dtype=jnp.float32),
        jax.random.normal(k2, (2, 8, 8, 8), dtype=jnp.float32),
        jax.random.normal(k3, (2, 3, 5, 7), dtype=jnp.float32),
    ]
    t_g = [
        jax.random.normal(k4, (2, 4, 16, 16), dtype=jnp.float32),
        jax.random.normal(k5, (2, 16, 8, 8), dtype=jnp.float32),
        jax.random.normal(k6, (2, 6, 5, 7), dtype=jnp.float32),
    ]

    loss = jax.block_until_ready(similarity_forward(s_g, t_g))
    ref = jax.block_until_ready(_reference(s_g, t_g))

    assert loss.shape == (1,)
    assert jnp.allclose(loss, ref, rtol=2e-5, atol=1e-5), (loss, ref)

    print("KERNEL_OK")
</pallas_src>

<mosaic_0001>
module attributes {stable_mosaic.version = 11 : i64} {
  func.func @_sp_fused_kernel(%arg0: i32, %arg1: memref<2x256xf32, #tpu.memory_space<vmem>>, %arg2: memref<2x256xf32, #tpu.memory_space<vmem>>, %arg3: memref<1x1xf32, #tpu.memory_space<smem>>, %arg4: memref<2x2xf32, #tpu.memory_space<vmem>>, %arg5: memref<2x2xf32, #tpu.memory_space<vmem>>) attributes {dimension_semantics = [#tpu.dimension_semantics<arbitrary>], iteration_bounds = array<i64: 4>, scalar_prefetch = 0 : i64, scratch_operands = 2 : i64, tpu.core_type = #tpu.core_type<tc>, window_params = [{transform_indices = @transform_0, window_bounds = array<i64: 2, 256>}, {transform_indices = @transform_1, window_bounds = array<i64: 2, 256>}, {transform_indices = @transform_2, window_bounds = array<i64: 1, 1>}]} {
    %c0_i32 = arith.constant 0 : i32
    %0 = arith.cmpi eq, %arg0, %c0_i32 : i32
    %1 = arith.extui %0 : i1 to i32
    %c0_i32_0 = arith.constant 0 : i32
    %2 = arith.cmpi ne, %1, %c0_i32_0 : i32
    scf.if %2 {
      %cst_14 = arith.constant 0.000000e+00 : f32
      %16 = vector.broadcast %cst_14 : f32 to vector<2x2xf32>
      %c0_15 = arith.constant 0 : index
      %c0_16 = arith.constant 0 : index
      %17 = vector.load %arg4[%c0_15, %c0_16] : memref<2x2xf32, #tpu.memory_space<vmem>>, vector<2x2xf32>
      tpu.vector_store %arg4[%c0_15, %c0_16], %16 {strides = array<i32>} : memref<2x2xf32, #tpu.memory_space<vmem>>, vector<2x2xf32>,
      %cst_17 = arith.constant 0.000000e+00 : f32
      %18 = vector.broadcast %cst_17 : f32 to vector<2x2xf32>
      %c0_18 = arith.constant 0 : index
      %c0_19 = arith.constant 0 : index
      %19 = vector.load %arg5[%c0_18, %c0_19] : memref<2x2xf32, #tpu.memory_space<vmem>>, vector<2x2xf32>
      tpu.vector_store %arg5[%c0_18, %c0_19], %18 {strides = array<i32>} : memref<2x2xf32, #tpu.memory_space<vmem>>, vector<2x2xf32>,
    } else {
    }
    %c0 = arith.constant 0 : index
    %c0_1 = arith.constant 0 : index
    %3 = vector.load %arg1[%c0, %c0_1] : memref<2x256xf32, #tpu.memory_space<vmem>>, vector<2x256xf32>
    %c0_2 = arith.constant 0 : index
    %c0_3 = arith.constant 0 : index
    %4 = vector.load %arg4[%c0_2, %c0_3] : memref<2x2xf32, #tpu.memory_space<vmem>>, vector<2x2xf32>
    %cst = arith.constant dense<0.000000e+00> : vector<2x2xf32>
    %5 = tpu.matmul %3, %3, %cst {dimension_numbers = #tpu.dot_dimension_numbers<[1], [1], [0], [0], [0, 0, 1, 0], [], []>} : vector<2x256xf32>, vector<2x256xf32>, vector<2x2xf32> -> vector<2x2xf32>
    %6 = arith.addf %4, %5 : vector<2x2xf32>
    %c0_4 = arith.constant 0 : index
    %c0_5 = arith.constant 0 : index
    %7 = vector.load %arg4[%c0_4, %c0_5] : memref<2x2xf32, #tpu.memory_space<vmem>>, vector<2x2xf32>
    tpu.vector_store %arg4[%c0_4, %c0_5], %6 {strides = array<i32>} : memref<2x2xf32, #tpu.memory_space<vmem>>, vector<2x2xf32>,
    %c0_6 = arith.constant 0 : index
    %c0_7 = arith.constant 0 : index
    %8 = vector.load %arg2[%c0_6, %c0_7] : memref<2x256xf32, #tpu.memory_space<vmem>>, vector<2x256xf32>
    %c0_8 = arith.constant 0 : index
    %c0_9 = arith.constant 0 : index
    %9 = vector.load %arg5[%c0_8, %c0_9] : memref<2x2xf32, #tpu.memory_space<vmem>>, vector<2x2xf32>
    %cst_10 = arith.constant dense<0.000000e+00> : vector<2x2xf32>
    %10 = tpu.matmul %8, %8, %cst_10 {dimension_numbers = #tpu.dot_dimension_numbers<[1], [1], [0], [0], [0, 0, 1, 0], [], []>} : vector<2x256xf32>, vector<2x256xf32>, vector<2x2xf32> -> vector<2x2xf32>
    %11 = arith.addf %9, %10 : vector<2x2xf32>
    %c0_11 = arith.constant 0 : index
    %c0_12 = arith.constant 0 : index
    %12 = vector.load %arg5[%c0_11, %c0_12] : memref<2x2xf32, #tpu.memory_space<vmem>>, vector<2x2xf32>
    tpu.vector_store %arg5[%c0_11, %c0_12], %11 {strides = array<i32>} : memref<2x2xf32, #tpu.memory_space<vmem>>, vector<2x2xf32>,
    %c3_i32 = arith.constant 3 : i32
    %13 = arith.cmpi eq, %arg0, %c3_i32 : i32
    %14 = arith.extui %13 : i1 to i32
    %c0_i32_13 = arith.constant 0 : i32
    %15 = arith.cmpi ne, %14, %c0_i32_13 : i32
    scf.if %15 {
      %c0_14 = arith.constant 0 : index
      %c0_15 = arith.constant 0 : index
      %16 = vector.load %arg4[%c0_14, %c0_15] : memref<2x2xf32, #tpu.memory_space<vmem>>, vector<2x2xf32>
      %c0_16 = arith.constant 0 : index
      %c0_17 = arith.constant 0 : index
      %17 = vector.load %arg5[%c0_16, %c0_17] : memref<2x2xf32, #tpu.memory_space<vmem>>, vector<2x2xf32>
      %18 = arith.mulf %16, %16 : vector<2x2xf32>
      %cst_18 = arith.constant dense<0.000000e+00> : vector<2xf32>
      %19 = vector.multi_reduction <add>, %18, %cst_18 [1] : vector<2x2xf32> to vector<2xf32>
      %20 = vector.shape_cast %19 : vector<2xf32> to vector<2x1xf32>
      %21 = math.sqrt %20 : vector<2x1xf32>
      %cst_19 = arith.constant 9.99999996E-13 : f32
      %22 = vector.broadcast %cst_19 : f32 to vector<2x1xf32>
      %23 = arith.maximumf %21, %22 : vector<2x1xf32>
      %24 = vector.broadcast %23 : vector<2x1xf32> to vector<2x2xf32>
      %25 = arith.divf %16, %24 : vector<2x2xf32>
      %26 = arith.mulf %17, %17 : vector<2x2xf32>
      %cst_20 = arith.constant dense<0.000000e+00> : vector<2xf32>
      %27 = vector.multi_reduction <add>, %26, %cst_20 [1] : vector<2x2xf32> to vector<2xf32>
      %28 = vector.shape_cast %27 : vector<2xf32> to vector<2x1xf32>
      %29 = math.sqrt %28 : vector<2x1xf32>
      %cst_21 = arith.constant 9.99999996E-13 : f32
      %30 = vector.broadcast %cst_21 : f32 to vector<2x1xf32>
      %31 = arith.maximumf %29, %30 : vector<2x1xf32>
      %32 = vector.broadcast %31 : vector<2x1xf32> to vector<2x2xf32>
      %33 = arith.divf %17, %32 : vector<2x2xf32>
      %34 = arith.subf %33, %25 : vector<2x2xf32>
      %35 = arith.mulf %34, %34 : vector<2x2xf32>
      %36 = vector.shape_cast %35 : vector<2x2xf32> to vector<1x2x2xf32>
      %cst_22 = arith.constant dense<0.000000e+00> : vector<1xf32>
      %37 = vector.multi_reduction <add>, %36, %cst_22 [1, 2] : vector<1x2x2xf32> to vector<1xf32>
      %38 = vector.shape_cast %37 : vector<1xf32> to vector<1x1x1xf32>
      %39 = vector.extract %38[0, 0, 0] : f32 from vector<1x1x1xf32>
      %cst_23 = arith.constant 2.500000e-01 : f32
      %40 = arith.mulf %39, %cst_23 : f32
      %c0_24 = arith.constant 0 : index
      %c0_25 = arith.constant 0 : index
      %41 = memref.load %arg3[%c0_24, %c0_25] : memref<1x1xf32, #tpu.memory_space<smem>>
      memref.store %40, %arg3[%c0_24, %c0_25] : memref<1x1xf32, #tpu.memory_space<smem>>
    } else {
    }
    return
  }
  func.func @transform_0(%arg0: i32) -> (i32, i32) {
    %c0_i32 = arith.constant 0 : i32
    %c0_i32_0 = arith.constant 0 : i32
    return %c0_i32, %arg0 : i32, i32
  }
  func.func @transform_1(%arg0: i32) -> (i32, i32) {
    %c0_i32 = arith.constant 0 : i32
    %c0_i32_0 = arith.constant 0 : i32
    return %c0_i32, %arg0 : i32, i32
  }
  func.func @transform_2(%arg0: i32) -> (i32, i32) {
    %c0_i32 = arith.constant 0 : i32
    %c0_i32_0 = arith.constant 0 : i32
    %c0_i32_1 = arith.constant 0 : i32
    return %c0_i32, %c0_i32_0 : i32, i32
  }
}

</mosaic_0001>

<bundles_post_ra>
// kernel: tpu_custom_call.1
= control target key start
LH: loop header
LB: loop body
LE: loop exit
PB: predicated region body
PF: predicated region fallthrough
CT: control target
= control target key end

     0   :  { %7 = vsyncpa [#allocation5], 0  ;;  %s865_s0 = inlined_call_operand.hbm [shape: f32[2,1024], index: 0, kind: input, shape index: {}]   ;;  %s866_s1 = inlined_call_operand.hbm [shape: f32[2,1024], index: 1, kind: input, shape index: {}]   ;;  %s867_s2 = inlined_call_operand.hbm [shape: f32[1,1], index: 2, kind: output, shape index: {}]  }
   0x1   :  { %9 = vsyncpa [#allocation5 + $0x1], 0 }
   0x2   :  { %10 = vsyncpa [#allocation8], 0 }
   0x3   :  { %12 = vsyncpa [#allocation8 + $0x1], 0 }
   0x4   :  { %13 = vsyncpa [#allocation6], 0  ;;  %s707_s9 = smov 0   ;;  %s709_s10 = smov 0  }
   0x5   :  { %s711_s11 = smov 0   ;;  %s713_s12 = smov 0  }
   0x6 LB: > { %s726_s13 = sadd.s32 4294967295, %s686_s12   ;;  %s729_s14 = sadd.s32 1, %s686_s12   ;;  %s686_s12 = sphi %s713_s12, %s879_s12   ;;  %s682_s11 = sphi %s711_s11, %s878_s11   ;;  %s678_s10 = sphi %s709_s10, %s877_s10   ;;  %s674_s9 = sphi %s707_s9, %s876_s9  }
   0x7   : > { %s23_s15 = ssub.s32 %s686_s12, %s729_s14  ;;  %s26_s16 = sadd.s32 1, %s682_s11 }
   0x8   : > { %p24_p0 = scmp.eq.s32.totalorder %s23_s15, 0  ;;  %p33_p1 = scmp.ne.s32.totalorder %s682_s11, %s678_s10 }
   0x9   : > { %p34_p2 = scmp.eq.s32.totalorder %s686_s12, 0  ;;  %p39_p3 = scmp.ne.s32.totalorder %s678_s10, %s674_s9 }
   0xa   : > { %s739_s17 = scalar_select %p24_p0, %s682_s11, %s26_s16  }
   0xb   : > { %p35_p4 = por %p34_p2, %p33_p1  ;;  %p40_p5 = scmp.eq.s32.totalorder %s726_s13, 0 }
   0xc   : > { %p533_p6 = scmp.lt.s32.totalorder %s686_s12, 4  ;;  %s748_s19 = sand.u32 1, %s682_s11  }
   0xd   : > { %p743_p7 = por %p40_p5, %p39_p3  ;;  %s497_s20 = sshll.u32 %s748_s19, 2 }
   0xe   : > { %s514_s21 = sshll.u32 %s686_s12, 6  ;;  %s114_s25 = scalar_lea.vmem [#allocation4], %s497_s20 }
   0xf   : > { %s869_s18 = scalar_select %p743_p7, 1, 0 }
  0x10   : > { %s757_s24 = scalar_lea.hbm %s865_s0, %s514_s21  ;;  %s122_s26 = sshll.u32 %s114_s25, 4  ;;  %s761_s26 = int_to_ptr.vmem [resolvable:$true] %s122_s26 }
  0x11   : > { %p763_p8 = pnand %p533_p6, %p35_p4  ;;  %s111_s28 = scalar_lea.sflag [#allocation5], %s748_s19 }
  0x12   : > { %s578_s29 = scalar_lea.hbm %s757_s24, 64  ;;  %s583_s4 = scalar_lea.hbm %s865_s0, 256 }
  0x13   : > { %p579_p11 = scmp.ne.s32.totalorder %s757_s24, %s578_s29  ;;  %p580_p12 = pneg %p763_p8 }
  0x14   : > { %p584_p1 = scmp.lt.s32.totalorder %s757_s24, %s865_s0  ;;  %p585_p2 = scmp.lt.s32.totalorder %s583_s4, %s578_s29 }
  0x15   : > { %p581_p13 = pnand %p580_p12, %p579_p11 }
  0x16   : > { %p586_p3 = por %p585_p2, %p584_p1 }
  0x17   : > { %p582_p0 = pneg %p581_p13 }
  0x19   : > { %p587_p4 = pnand %p586_p3, %p582_p0 }
  0x1b   : > { %590 = shalt.err (!%p587_p4)
}
  0x1c   : > { %s591_s7 = scalar_lea.vmem %s761_s26, 64  ;;  %s688_s8 = smov [#allocation4]  }
  0x1d   : > { %p592_p5 = scmp.ne.s32.totalorder %s761_s26, %s591_s7  ;;  %s596_s9 = sshll.u32 %s688_s8, 4  ;;  %s597_s9 = int_to_ptr.vmem [resolvable:$false] %s596_s9 }
  0x1e   : > { %s598_s15 = scalar_lea.vmem %s597_s9, 128  ;;  %p599_p13 = scmp.lt.s32.totalorder %s761_s26, %s597_s9 }
  0x1f   : > { %p594_p6 = pnand %p592_p5, %p580_p12  ;;  %p600_p9 = scmp.lt.s32.totalorder %s598_s15, %s591_s7 }
  0x21   : > { %p595_p11 = pneg %p594_p6  ;;  %p601_p10 = por %p600_p9, %p599_p13 }
  0x23   : > { %p602_p1 = pnand %p601_p10, %p595_p11 }
  0x25   : > { %605 = shalt.err (!%p602_p1)
}
  0x26   : > { %529 = dma.hbm_to_vmem [thread:$0]  (!%p763_p8), %s757_s24, 64, %s761_s26, %s111_s28  }
  0x27   : > { %p871_p0 = scmp.lt.s32.totalorder %s686_s12, 5  ;;  %p872_p2 = scmp.ge.s32.totalorder %s686_s12, 1 }
  0x28   : > { %s807_s25 = scalar_lea.hbm %s866_s1, %s514_s21  ;;  %s133_s29 = scalar_lea.vmem [#allocation7], %s497_s20 }
  0x29   : > { %p798_p3 = pnand %p872_p2, %p871_p0  ;;  %s141_s30 = sshll.u32 %s133_s29, 4  ;;  %s142_s30 = int_to_ptr.vmem [resolvable:$true] %s141_s30 }
  0x2a   : > { %s130_s24 = scalar_lea.sflag [#allocation8], %s748_s19  ;;  %s606_s26 = scalar_lea.hbm %s807_s25, 64 }
  0x2b   : > { %s873_s16 = scalar_select %p798_p3, 1, 0 }
  0x2c   : > { %p607_p9 = scmp.ne.s32.totalorder %s807_s25, %s606_s26  ;;  %s611_s3 = scalar_lea.hbm %s866_s1, 256 }
  0x2d   : > { %p612_p5 = scmp.lt.s32.totalorder %s807_s25, %s866_s1  ;;  %p613_p6 = scmp.lt.s32.totalorder %s611_s3, %s606_s26 }
  0x2e   : > { %p609_p10 = pnand %p607_p9, %p580_p12 }
  0x2f   : > { %p614_p11 = por %p613_p6, %p612_p5 }
  0x30   : > { %p610_p4 = pneg %p609_p10 }
  0x32   : > { %p615_p13 = pnand %p614_p11, %p610_p4 }
  0x34   : > { %618 = shalt.err (!%p615_p13)
}
  0x35   : > { %s619_s20 = scalar_lea.vmem %s142_s30, 64  ;;  %s689_s19 = smov [#allocation7]  }
  0x36   : > { %p620_p1 = scmp.ne.s32.totalorder %s142_s30, %s619_s20  ;;  %s624_s5 = sshll.u32 %s689_s19, 4  ;;  %s625_s5 = int_to_ptr.vmem [resolvable:$false] %s624_s5 }
  0x37   : > { %s626_s6 = scalar_lea.vmem %s625_s5, 128  ;;  %p627_p9 = scmp.lt.s32.totalorder %s142_s30, %s625_s5 }
  0x38   : > { %p622_p0 = pnand %p620_p1, %p580_p12  ;;  %p628_p10 = scmp.lt.s32.totalorder %s626_s6, %s619_s20 }
  0x3a   : > { %p623_p2 = pneg %p622_p0  ;;  %p629_p7 = por %p628_p10, %p627_p9 }
  0x3c   : > { %p630_p3 = pnand %p629_p7, %p623_p2 }
  0x3e   : > { %633 = shalt.err (!%p630_p3)
}
  0x3f   : > { %532 = dma.hbm_to_vmem [thread:$0]  (!%p763_p8), %s807_s25, 64, %s142_s30, %s130_s24  }
  0x40   : > { %p874_p4 = scmp.ne.s32.totalorder %s873_s16, 0 }
  0x41   : > { %s152_s7 = sand.u32 (!%p874_p4), 1, %s678_s10   ;;  %p875_p12 = scmp.ne.s32.totalorder (!%p874_p4), %s869_s18, 0 }
  0x42   : > { %150 = sbr.rel (%p874_p4) target bundleno = 688 (0x2b0), region = 28  ;;  %s504_s8 = sshll.u32 (!%p874_p4), %s152_s7, 2 }
  0x43   : > { %s153_s9 = scalar_lea.sflag (!%p874_p4), [#allocation5], %s152_s7  ;;  %s156_s15 = scalar_lea.vmem (!%p874_p4), [#allocation4], %s504_s8 }
  0x47   : > { %661 = dma.done.wait (%p875_p12), %s153_s9, 64  }
  0x48   : > { %663 = vsyncadd (%p875_p12), %s153_s9, 4294967232  ;;  %s162_s22 = scalar_lea.sflag [#allocation8], %s152_s7  ;;  %s165_s23 = scalar_lea.vmem [#allocation7], %s504_s8 }
  0x49   : > { %665 = dma.done.wait (%p875_p12), %s162_s22, 64  }
  0x4a   : > { %667 = vsyncadd (%p875_p12), %s162_s22, 4294967232  ;;  %p506_p7 = scmp.ne.s32.totalorder %s726_s13, 0 }
  0x4c   : > { %191 = sbr.rel (%p506_p7) target bundleno = 83 (0x53), region = 40 }
  0x51   : > { %vm192_vm0 = vcmask 9216   ;;  %v690_v0 = vmov 0.0  }
  0x52   : > { %193 = vst.msk [vmem:[#allocation2] sm:$0x3] %vm192_vm0, %v690_v0  ;;  %194 = vst.msk [vmem:[#allocation3] sm:$0x3] %vm192_vm0, %v690_v0 }
  0x53 PF: > { %v507_v1 = vld.sshfl [vmem:[%s156_s15] sm:$0x33 pattern:$0x76325410]  ;;  %vm279_vm1 = vcmask 9216   ;;  %p509_p8 = scmp.ne.s32.totalorder %s726_s13, 3 }
  0x54   : > { %v205_v2 = vcombine.high %v507_v1, %v507_v1  ;;  %v508_v3 = vld.sshfl [vmem:[%s165_s23] sm:$0x33 pattern:$0x76325410] }
  0x55   : > { %v291_v4 = vcombine.high %v508_v3, %v508_v3 }
  0x56   : > { %238 = vmatprep.subr.mxu0 %v205_v2  ;;  %272 = vmatprep.mubr.f32.mxu0 %v205_v2 }
  0x57   : > { %324 = vmatprep.subr.mxu1 %v291_v4  ;;  %239 = vmatpush1.xpose.msra.mxu0 %v507_v1 }
  0x58   : > { %325 = vmatpush1.xpose.msra.mxu1 %v508_v3  ;;  %358 = vmatprep.mubr.f32.mxu1 %v291_v4 }
  0x59   : > { %v196_v5 = vld [vmem:[#allocation2] sm:$0x3]  ;;  %v282_v6 = vld [vmem:[#allocation3] sm:$0x3] }
  0x5a   : > { %273 = vmatmul.mubr.f32.vlgmr.msra.gmra.mxu0 %v507_v1 }
  0x5b   : > { %359 = vmatmul.mubr.f32.vlgmr.msra.gmra.mxu1 %v508_v3 }
 0x11a   : > { %v274_v7 = vpop.f32.mrf.mxu0  ;;  %369 = sbr.rel (%p509_p8) target bundleno = 682 (0x2aa), region = 44 }
 0x11b   : > { %v278_v8 = vadd.f32 %v274_v7, %v196_v5  ;;  %v360_v9 = vpop.f32.mrf.mxu1 }
 0x11c   : > { %v364_v10 = vadd.f32 %v360_v9, %v282_v6  ;;  %v276_v11 = vpop.f32.mrf.mxu0 }
 0x11d   : > { %280 = vst.msk [vmem:[#allocation2] sm:$0x3] %vm279_vm1, %v278_v8  ;;  %v362_v12 = vpop.f32.mrf.mxu1 }
 0x11e   : > { %365 = vst.msk [vmem:[#allocation3] sm:$0x3] %vm279_vm1, %v364_v10 }
 0x124   : > { %v370_v13 = vld [vmem:[#allocation2] sm:$0x3] }
 0x125   : > { %v371_v14 = vld [vmem:[#allocation3] sm:$0x3]  ;;  %v372_v15 = vmul.f32 %v370_v13, %v370_v13 }
 0x126   : > { %v386_v16 = vmul.f32 %v371_v14, %v371_v14 }
 0x127   : > { %v373_v17 = vsel %vm279_vm1, %v372_v15, 0.0 }
 0x128   : > { %374 = vadd.xlane.f32.xlu0 %v373_v17  ;;  %v387_v18 = vsel %vm279_vm1, %v386_v16, 0.0 }
 0x12c   : > { %388 = vadd.xlane.f32.xlu0 %v387_v18 }
 0x1b1   : > { %v375_v19 = vpop.xlane.xlu0 %374 }
 0x1b2   : > { %570 = vrsqrt.f32 %v375_v19  ;;  %vm378_vm2 = vcmp.eq.f32.partialorder %v375_v19, inf  ;;  %v381_v23 = vand.u32 2147483648, %v375_v19  ;;  %vm380_vm3 = vcmp.eq.f32.partialorder %v375_v19, 0.0 }
 0x1b5   : > { %v389_v20 = vpop.xlane.xlu0 %388 }
 0x1b6   : > { %572 = vrsqrt.f32 %v389_v20  ;;  %vm392_vm4 = vcmp.eq.f32.partialorder %v389_v20, inf  ;;  %v395_v29 = vand.u32 2147483648, %v389_v20  ;;  %vm394_vm5 = vcmp.eq.f32.partialorder %v389_v20, 0.0 }
 0x1bf   : > { %v571_v21 = vpop.eup %570 }
 0x1c0   : > { %v377_v22 = vmul.f32 %v571_v21, %v375_v19 }
 0x1c2   : > { %v379_v24 = vsel %vm378_vm2, %v375_v19, %v377_v22 }
 0x1c3   : > { %v573_v25 = vpop.eup %572  ;;  %v382_v26 = vsel %vm380_vm3, %v381_v23, %v379_v24 }
 0x1c4   : > { %v383_v27 = vmax.f32 %v382_v26, 1e-12  ;;  %v391_v28 = vmul.f32 %v573_v25, %v389_v20 }
 0x1c6   : > { %v393_v30 = vsel %vm392_vm4, %v389_v20, %v391_v28  ;;  %574 = vrcp.f32 %v383_v27 }
 0x1c7   : > { %v396_v31 = vsel %vm394_vm5, %v395_v29, %v393_v30 }
 0x1c8   : > { %v397_v32 = vmax.f32 %v396_v31, 1e-12 }
 0x1ca   : > { %576 = vrcp.f32 %v397_v32 }
 0x1d3   : > { %v575_v33 = vpop.eup %574 }
 0x1d4   : > { %v385_v35 = vmul.f32 %v575_v33, %v370_v13 }
 0x1d7   : > { %v577_v34 = vpop.eup %576 }
 0x1d8   : > { %v399_v36 = vmul.f32 %v577_v34, %v371_v14 }
 0x1da   : > { %v400_v37 = vsub.f32 %v399_v36, %v385_v35 }
 0x1dc   : > { %v401_v38 = vmul.f32 %v400_v37, %v400_v37 }
 0x1de   : > { %v402_v39 = vsel %vm279_vm1, %v401_v38, 0.0 }
 0x1df   : > { %403 = vadd.xlane.f32.xlu1 %v402_v39 }
 0x268   : > { %v404_v40 = vpop.xlane.xlu1 %403 }
 0x269   : > { %v405_v41 = vrot.slane %v404_v40, 4 }
 0x26b   : > { %v406_v42 = vadd.f32 %v405_v41, %v404_v40 }
 0x26d   : > { %v407_v43 = vrot.slane %v406_v42, 2 }
 0x26f   : > { %v408_v44 = vadd.f32 %v407_v43, %v406_v42 }
 0x271   : > { %v409_v45 = vrot.slane %v408_v44, 1 }
 0x273   : > { %v410_v46 = vadd.f32 %v409_v45, %v408_v44 }
 0x275   : > { %516 = vpush %v410_v46 }
 0x2a6   : > { %s517_s18 = spop %516 }
 0x2a7   : > { %s412_s27 = smul.f32 0.25, %s517_s18 }
 0x2a9   : > { %414 = sst [smem:[#allocation9]] %s412_s27 }
 0x2aa PF: > { %p534_p3 = scmp.eq.s32.totalorder %s726_s13, 3  ;;  %s691_s16 = smov [#allocation9]  }
 0x2ac   : > { %523 = dma.smem_to_hbm (%p534_p3), %s691_s16, 16, %s867_s2, [#allocation6]  }
 0x2ad   : > { %669 = dma.done.wait (%p534_p3), [#allocation6], 16  }
 0x2ae   : > { %671 = vsyncadd (%p534_p3), [#allocation6], 4294967280 }
 0x2af   : > { %428 = sfence }
 0x2b0 PF: > { %p16_p5 = scmp.ge.s32.totalorder %s729_s14, 6   ;;  %s876_s9 = smov %s678_s10 }
 0x2b1   : > { %s877_s10 = smov %s682_s11  ;;  %s878_s11 = smov %s739_s17 }
 0x2b2   : > { %s879_s12 = smov %s729_s14  ;;  %18 = sbr.rel (!%p16_p5) target bundleno = 6 (0x6), region = 87 }
 0x2b7   :  { %434 = vsyncpa [#allocation5], 1 }
 0x2b8   :  { %436 = vsyncpa [#allocation5 + $0x1], 1 }
 0x2b9   :  { %437 = vsyncpa [#allocation8], 1 }
 0x2ba   :  { %439 = vsyncpa [#allocation8 + $0x1], 1 }
 0x2bb   :  { %440 = vsyncpa [#allocation6], 1 }
 0x2bc   :  { %442 = vsyncpa [#allocation6 + $0x1], 1 }

</bundles_post_ra>
